<compile_context>
chip_gen: v6e
topology: v6e:2x2x1
jax: 0.10.0
libtpu: 0.0.40
codegen_flags: <defaults>
</compile_context>

<pallas_src>
import functools

import jax
import jax.numpy as jnp
from jax import lax
from jax.experimental import pallas as pl
from jax.experimental.pallas import tpu as pltpu

LANE = 128
SUBLANE_BF16 = 16
_VMEM_LIMIT = 32 * 1024 * 1024  # scoped-VMEM budget that is safe on v7x (64 MiB phys)


def _round_up(x, m):
    return ((x + m - 1) // m) * m


# ---------------------------------------------------------------------------
# Kernel 1: input projection  P = X @ W_ih + b_h   (off the serial chain)
# ---------------------------------------------------------------------------
def proj_kernel(x_ref, w_ih_ref, b_h_ref, p_ref):
    tt, b, e = x_ref.shape
    h = w_ih_ref.shape[1]
    x2d = x_ref[...].reshape(tt * b, e)  # free collapse: b is a multiple of 16 (bf16 tile)
    p = jnp.dot(x2d, w_ih_ref[...], preferred_element_type=jnp.float32)
    p_ref[...] = (p + b_h_ref[...]).reshape(tt, b, h)


# ---------------------------------------------------------------------------
# Kernel 2: serial recurrence + final FC on the last hidden state
# ---------------------------------------------------------------------------
def recurrence_kernel(p_ref, w_hh_ref, w_fc_ref, b_fc_ref, out_ref, h_ref, *,
                      seq_len, time_chunk):
    t_idx = pl.program_id(1)

    @pl.when(t_idx == 0)
    def _init():
        h_ref[...] = jnp.zeros_like(h_ref)

    w_hh = w_hh_ref[...]                         # hoisted out of the loop
    base = t_idx * time_chunk
    needs_mask = (seq_len % time_chunk) != 0     # static (Python bool)

    def step(t, h):
        pre = p_ref[t] + jnp.dot(h.astype(jnp.bfloat16), w_hh,
                                 preferred_element_type=jnp.float32)
        h_new = jnp.tanh(pre)                    # f32 hidden state / tanh (EUP)
        if needs_mask:                           # only pay the select if T % chunk != 0
            h_new = jnp.where(base + t < seq_len, h_new, h)
        return h_new

    h = lax.fori_loop(0, time_chunk, step, h_ref[...], unroll=True)
    h_ref[...] = h                               # persists across time chunks

    @pl.when(t_idx == pl.num_programs(1) - 1)
    def _finalize():
        out_ref[...] = (jnp.dot(h.astype(jnp.bfloat16), w_fc_ref[...],
                                preferred_element_type=jnp.float32)
                        + b_fc_ref[...]).astype(out_ref.dtype)


# ---------------------------------------------------------------------------
# Wrapper
# ---------------------------------------------------------------------------
def rnn_text_forward(token_ids, params, *, time_chunk=None):
    """token_ids: int32 (B, T). Returns logits (B, num_classes) float32."""
    emb = params["embedding"]   # (V, E)
    w_ih = params["w_ih"]       # (E, H)
    w_hh = params["w_hh"]       # (H, H)
    b_h = params["b_h"]         # (1, H) = b_ih + b_hh
    w_fc = params["w_fc"]       # (H, C)
    b_fc = params["b_fc"]       # (1, C)

    B, T = token_ids.shape
    V, E = emb.shape
    H = w_hh.shape[0]
    C = w_fc.shape[1]

    B_pad = _round_up(B, SUBLANE_BF16)
    E_pad = _round_up(E, LANE)
    H_pad = _round_up(H, LANE)
    C_pad = _round_up(C, LANE)

    if time_chunk is None:
        per_t = B_pad * E_pad * 2 + B_pad * H_pad * 4     # bf16 x + f32 P per step
        time_chunk = int(max(1, min(T, 32, (4 << 20) // per_t)))
    n_tc = pl.cdiv(T, time_chunk)
    T_pad = n_tc * time_chunk

    f32, bf16 = jnp.float32, jnp.bfloat16
    # Zero-pad params to tile-aligned shapes (zeros keep the real slice exact).
    emb_p = jnp.zeros((V, E_pad), bf16).at[:, :E].set(emb.astype(bf16))
    w_ih_p = jnp.zeros((E_pad, H_pad), bf16).at[:E, :H].set(w_ih.astype(bf16))
    w_hh_p = jnp.zeros((H_pad, H_pad), bf16).at[:H, :H].set(w_hh.astype(bf16))
    b_h_p = jnp.zeros((1, H_pad), f32).at[:, :H].set(b_h)
    w_fc_p = jnp.zeros((H_pad, C_pad), bf16).at[:H, :C].set(w_fc.astype(bf16))
    b_fc_p = jnp.zeros((1, C_pad), f32).at[:, :C].set(b_fc)

    tok_p = jnp.zeros((B_pad, T_pad), token_ids.dtype).at[:B, :T].set(token_ids)
    # Time-major gather directly (no (B,T,E)->(T,B,E) transpose of the big tensor).
    x_tm = jnp.take(emb_p, tok_p.T, axis=0)                 # (T_pad, B_pad, E_pad) bf16

    # ---- phase 1: projection, parallel over time chunks ----
    p_act = pl.pallas_call(
        proj_kernel,
        out_shape=jax.ShapeDtypeStruct((T_pad, B_pad, H_pad), f32),
        grid_spec=pltpu.PrefetchScalarGridSpec(
            num_scalar_prefetch=0,
            grid=(n_tc,),
            in_specs=[
                pl.BlockSpec((time_chunk, B_pad, E_pad), lambda t: (t, 0, 0)),
                pl.BlockSpec((E_pad, H_pad), lambda t: (0, 0)),   # resident
                pl.BlockSpec((1, H_pad), lambda t: (0, 0)),       # resident
            ],
            out_specs=pl.BlockSpec((time_chunk, B_pad, H_pad), lambda t: (t, 0, 0)),
        ),
        compiler_params=pltpu.CompilerParams(
            dimension_semantics=("parallel",),
            vmem_limit_bytes=_VMEM_LIMIT,
        ),
    )(x_tm, w_ih_p, b_h_p)

    # ---- phase 2: serial recurrence + FC ----
    n_b = 2 if (B_pad % (2 * SUBLANE_BF16) == 0) else 1   # v7x: one batch shard per TC
    Bt = B_pad // n_b

    kernel = functools.partial(recurrence_kernel, seq_len=T, time_chunk=time_chunk)
    out_pad = pl.pallas_call(
        kernel,
        out_shape=jax.ShapeDtypeStruct((B_pad, C_pad), f32),
        grid_spec=pltpu.PrefetchScalarGridSpec(
            num_scalar_prefetch=0,
            grid=(n_b, n_tc),
            in_specs=[
                pl.BlockSpec((time_chunk, Bt, H_pad), lambda b, t: (t, b, 0)),
                pl.BlockSpec((H_pad, H_pad), lambda b, t: (0, 0)),  # resident
                pl.BlockSpec((H_pad, C_pad), lambda b, t: (0, 0)),  # resident
                pl.BlockSpec((1, C_pad), lambda b, t: (0, 0)),      # resident
            ],
            out_specs=pl.BlockSpec((Bt, C_pad), lambda b, t: (b, 0)),
            scratch_shapes=[pltpu.VMEM((Bt, H_pad), f32)],          # hidden state
        ),
        compiler_params=pltpu.CompilerParams(
            dimension_semantics=("parallel", "arbitrary"),
            vmem_limit_bytes=_VMEM_LIMIT,
        ),
    )(p_act, w_hh_p, w_fc_p, b_fc_p)

    return out_pad[:B, :C]


# ---------------------------------------------------------------------------
# Params / reference
# ---------------------------------------------------------------------------
def init_params(key, vocab_size, embed_size, hidden_size, num_classes):
    ks = jax.random.split(key, 7)
    s = 1.0 / jnp.sqrt(hidden_size)
    return {
        "embedding": jax.random.normal(ks[0], (vocab_size, embed_size), jnp.float32),
        # stored as (in, out) == PyTorch weight.T
        "w_ih": jax.random.uniform(ks[1], (embed_size, hidden_size), jnp.float32, -s, s),
        "w_hh": jax.random.uniform(ks[2], (hidden_size, hidden_size), jnp.float32, -s, s),
        # b_h = b_ih + b_hh (they always appear summed)
        "b_h": (jax.random.uniform(ks[3], (1, hidden_size), jnp.float32, -s, s)
                + jax.random.uniform(ks[4], (1, hidden_size), jnp.float32, -s, s)),
        "w_fc": jax.random.uniform(ks[5], (hidden_size, num_classes), jnp.float32, -s, s),
        "b_fc": jax.random.uniform(ks[6], (1, num_classes), jnp.float32, -s, s),
    }


def reference_forward(token_ids, params):
    """Pure-JAX reference with the same mixed precision policy (bf16 matmul
    operands, f32 accumulation / hidden state / tanh), matching PyTorch
    RNNTextModel forward semantics (h_0 = 0, tanh RNN, FC on last timestep)."""
    bf16 = jnp.bfloat16
    emb = params["embedding"].astype(bf16)
    w_ih = params["w_ih"].astype(bf16)
    w_hh = params["w_hh"].astype(bf16)
    w_fc = params["w_fc"].astype(bf16)
    x = jnp.take(emb, token_ids, axis=0)                    # (B, T, E) bf16
    B, T, _ = x.shape
    H = params["w_hh"].shape[0]
    h = jnp.zeros((B, H), jnp.float32)
    for t in range(T):
        pre = (jnp.dot(x[:, t, :], w_ih, preferred_element_type=jnp.float32)
               + jnp.dot(h.astype(bf16), w_hh, preferred_element_type=jnp.float32)
               + params["b_h"])
        h = jnp.tanh(pre)
    return (jnp.dot(h.astype(bf16), w_fc, preferred_element_type=jnp.float32)
            + params["b_fc"])


if __name__ == "__main__":
    vocab_size, embed_size, hidden_size, num_classes = 64, 32, 32, 8
    batch, seq_len = 4, 8

    key = jax.random.PRNGKey(0)
    pkey, xkey = jax.random.split(key)
    params = init_params(pkey, vocab_size, embed_size, hidden_size, num_classes)
    token_ids = jax.random.randint(xkey, (batch, seq_len), 0, vocab_size,
                                   dtype=jnp.int32)

    logits = jax.block_until_ready(jax.jit(rnn_text_forward)(token_ids, params))
    ref = jax.block_until_ready(reference_forward(token_ids, params))

    assert logits.shape == (batch, num_classes)
    assert jnp.allclose(logits, ref, atol=5e-3, rtol=5e-3), \
        float(jnp.max(jnp.abs(logits - ref)))

    print("KERNEL_OK")
</pallas_src>

<mosaic_0001>
module attributes {stable_mosaic.version = 11 : i64} {
  func.func @proj_kernel(%arg0: i32, %arg1: memref<8x16x128xbf16, #tpu.memory_space<vmem>>, %arg2: memref<128x128xbf16, #tpu.memory_space<vmem>>, %arg3: memref<1x128xf32, #tpu.memory_space<vmem>>, %arg4: memref<8x16x128xf32, #tpu.memory_space<vmem>>) attributes {dimension_semantics = [#tpu.dimension_semantics<parallel>], iteration_bounds = array<i64: 1>, scalar_prefetch = 0 : i64, scratch_operands = 0 : i64, tpu.core_type = #tpu.core_type<tc>, window_params = [{transform_indices = @transform_0, window_bounds = array<i64: 8, 16, 128>}, {pipeline_mode = #tpu.pipeline_mode<synchronous>, transform_indices = @transform_1, window_bounds = array<i64: 128, 128>}, {pipeline_mode = #tpu.pipeline_mode<synchronous>, transform_indices = @transform_2, window_bounds = array<i64: 1, 128>}, {transform_indices = @transform_3, window_bounds = array<i64: 8, 16, 128>}]} {
    %c0 = arith.constant 0 : index
    %c0_0 = arith.constant 0 : index
    %c0_1 = arith.constant 0 : index
    %0 = vector.load %arg1[%c0, %c0_0, %c0_1] : memref<8x16x128xbf16, #tpu.memory_space<vmem>>, vector<8x16x128xbf16>
    %1 = vector.shape_cast %0 : vector<8x16x128xbf16> to vector<128x128xbf16>
    %c0_2 = arith.constant 0 : index
    %c0_3 = arith.constant 0 : index
    %2 = vector.load %arg2[%c0_2, %c0_3] : memref<128x128xbf16, #tpu.memory_space<vmem>>, vector<128x128xbf16>
    %cst = arith.constant dense<0.000000e+00> : vector<128x128xf32>
    %3 = tpu.matmul %1, %2, %cst {dimension_numbers = #tpu.dot_dimension_numbers<[1], [0], [0], [1], [0, 0, 1, 1], [], []>} : vector<128x128xbf16>, vector<128x128xbf16>, vector<128x128xf32> -> vector<128x128xf32>
    %c0_4 = arith.constant 0 : index
    %c0_5 = arith.constant 0 : index
    %4 = vector.load %arg3[%c0_4, %c0_5] : memref<1x128xf32, #tpu.memory_space<vmem>>, vector<1x128xf32>
    %5 = vector.broadcast %4 : vector<1x128xf32> to vector<128x128xf32>
    %6 = arith.addf %3, %5 : vector<128x128xf32>
    %7 = vector.shape_cast %6 : vector<128x128xf32> to vector<8x16x128xf32>
    %c0_6 = arith.constant 0 : index
    %c0_7 = arith.constant 0 : index
    %c0_8 = arith.constant 0 : index
    %8 = vector.load %arg4[%c0_6, %c0_7, %c0_8] : memref<8x16x128xf32, #tpu.memory_space<vmem>>, vector<8x16x128xf32>
    tpu.vector_store %arg4[%c0_6, %c0_7, %c0_8], %7 {strides = array<i32>} : memref<8x16x128xf32, #tpu.memory_space<vmem>>, vector<8x16x128xf32>,
    return
  }
  func.func @transform_0(%arg0: i32) -> (i32, i32, i32) {
    %c0_i32 = arith.constant 0 : i32
    %c0_i32_0 = arith.constant 0 : i32
    %c0_i32_1 = arith.constant 0 : i32
    return %arg0, %c0_i32, %c0_i32_0 : i32, i32, i32
  }
  func.func @transform_1(%arg0: i32) -> (i32, i32) {
    %c0_i32 = arith.constant 0 : i32
    %c0_i32_0 = arith.constant 0 : i32
    %c0_i32_1 = arith.constant 0 : i32
    return %c0_i32, %c0_i32_0 : i32, i32
  }
  func.func @transform_2(%arg0: i32) -> (i32, i32) {
    %c0_i32 = arith.constant 0 : i32
    %c0_i32_0 = arith.constant 0 : i32
    %c0_i32_1 = arith.constant 0 : i32
    return %c0_i32, %c0_i32_0 : i32, i32
  }
  func.func @transform_3(%arg0: i32) -> (i32, i32, i32) {
    %c0_i32 = arith.constant 0 : i32
    %c0_i32_0 = arith.constant 0 : i32
    %c0_i32_1 = arith.constant 0 : i32
    return %arg0, %c0_i32, %c0_i32_0 : i32, i32, i32
  }
}

module attributes {stable_mosaic.version = 11 : i64} {
  func.func @recurrence_kernel(%arg0: i32, %arg1: i32, %arg2: memref<8x16x128xf32, #tpu.memory_space<vmem>>, %arg3: memref<128x128xbf16, #tpu.memory_space<vmem>>, %arg4: memref<128x128xbf16, #tpu.memory_space<vmem>>, %arg5: memref<1x128xf32, #tpu.memory_space<vmem>>, %arg6: memref<16x128xf32, #tpu.memory_space<vmem>>, %arg7: memref<16x128xf32, #tpu.memory_space<vmem>>) attributes {dimension_semantics = [#tpu.dimension_semantics<parallel>, #tpu.dimension_semantics<arbitrary>], iteration_bounds = array<i64: 1, 1>, scalar_prefetch = 0 : i64, scratch_operands = 1 : i64, tpu.core_type = #tpu.core_type<tc>, window_params = [{transform_indices = @transform_0, window_bounds = array<i64: 8, 16, 128>}, {pipeline_mode = #tpu.pipeline_mode<synchronous>, transform_indices = @transform_1, window_bounds = array<i64: 128, 128>}, {pipeline_mode = #tpu.pipeline_mode<synchronous>, transform_indices = @transform_2, window_bounds = array<i64: 128, 128>}, {pipeline_mode = #tpu.pipeline_mode<synchronous>, transform_indices = @transform_3, window_bounds = array<i64: 1, 128>}, {transform_indices = @transform_4, window_bounds = array<i64: 16, 128>}]} {
    %c0_i32 = arith.constant 0 : i32
    %0 = arith.cmpi eq, %arg1, %c0_i32 : i32
    %1 = arith.extui %0 : i1 to i32
    %c0_i32_0 = arith.constant 0 : i32
    %2 = arith.cmpi ne, %1, %c0_i32_0 : i32
    scf.if %2 {
      %cst_32 = arith.constant 0.000000e+00 : f32
      %65 = vector.broadcast %cst_32 : f32 to vector<16x128xf32>
      %c0_33 = arith.constant 0 : index
      %c0_34 = arith.constant 0 : index
      %66 = vector.load %arg7[%c0_33, %c0_34] : memref<16x128xf32, #tpu.memory_space<vmem>>, vector<16x128xf32>
      tpu.vector_store %arg7[%c0_33, %c0_34], %65 {strides = array<i32>} : memref<16x128xf32, #tpu.memory_space<vmem>>, vector<16x128xf32>,
    } else {
    }
    %c0 = arith.constant 0 : index
    %c0_1 = arith.constant 0 : index
    %3 = vector.load %arg3[%c0, %c0_1] : memref<128x128xbf16, #tpu.memory_space<vmem>>, vector<128x128xbf16>
    %c0_2 = arith.constant 0 : index
    %c0_3 = arith.constant 0 : index
    %4 = vector.load %arg7[%c0_2, %c0_3] : memref<16x128xf32, #tpu.memory_space<vmem>>, vector<16x128xf32>
    %c0_i32_4 = arith.constant 0 : i32
    %5 = arith.index_cast %c0_i32_4 : i32 to index
    %c0_5 = arith.constant 0 : index
    %c0_6 = arith.constant 0 : index
    %6 = vector.load %arg2[%5, %c0_5, %c0_6] : memref<8x16x128xf32, #tpu.memory_space<vmem>>, vector<1x16x128xf32>
    %7 = vector.shape_cast %6 : vector<1x16x128xf32> to vector<16x128xf32>
    %8 = arith.truncf %4 : vector<16x128xf32> to vector<16x128xbf16>
    %cst = arith.constant dense<0.000000e+00> : vector<16x128xf32>
    %9 = tpu.matmul %8, %3, %cst {dimension_numbers = #tpu.dot_dimension_numbers<[1], [0], [0], [1], [0, 0, 1, 1], [], []>} : vector<16x128xbf16>, vector<128x128xbf16>, vector<16x128xf32> -> vector<16x128xf32>
    %10 = arith.addf %7, %9 : vector<16x128xf32>
    %11 = math.tanh %10 : vector<16x128xf32>
    %c1_i32 = arith.constant 1 : i32
    %12 = arith.index_cast %c1_i32 : i32 to index
    %c0_7 = arith.constant 0 : index
    %c0_8 = arith.constant 0 : index
    %13 = vector.load %arg2[%12, %c0_7, %c0_8] : memref<8x16x128xf32, #tpu.memory_space<vmem>>, vector<1x16x128xf32>
    %14 = vector.shape_cast %13 : vector<1x16x128xf32> to vector<16x128xf32>
    %15 = arith.truncf %11 : vector<16x128xf32> to vector<16x128xbf16>
    %cst_9 = arith.constant dense<0.000000e+00> : vector<16x128xf32>
    %16 = tpu.matmul %15, %3, %cst_9 {dimension_numbers = #tpu.dot_dimension_numbers<[1], [0], [0], [1], [0, 0, 1, 1], [], []>} : vector<16x128xbf16>, vector<128x128xbf16>, vector<16x128xf32> -> vector<16x128xf32>
    %17 = arith.addf %14, %16 : vector<16x128xf32>
    %18 = math.tanh %17 : vector<16x128xf32>
    %c2_i32 = arith.constant 2 : i32
    %19 = arith.index_cast %c2_i32 : i32 to index
    %c0_10 = arith.constant 0 : index
    %c0_11 = arith.constant 0 : index
    %20 = vector.load %arg2[%19, %c0_10, %c0_11] : memref<8x16x128xf32, #tpu.memory_space<vmem>>, vector<1x16x128xf32>
    %21 = vector.shape_cast %20 : vector<1x16x128xf32> to vector<16x128xf32>
    %22 = arith.truncf %18 : vector<16x128xf32> to vector<16x128xbf16>
    %cst_12 = arith.constant dense<0.000000e+00> : vector<16x128xf32>
    %23 = tpu.matmul %22, %3, %cst_12 {dimension_numbers = #tpu.dot_dimension_numbers<[1], [0], [0], [1], [0, 0, 1, 1], [], []>} : vector<16x128xbf16>, vector<128x128xbf16>, vector<16x128xf32> -> vector<16x128xf32>
    %24 = arith.addf %21, %23 : vector<16x128xf32>
    %25 = math.tanh %24 : vector<16x128xf32>
    %c3_i32 = arith.constant 3 : i32
    %26 = arith.index_cast %c3_i32 : i32 to index
    %c0_13 = arith.constant 0 : index
    %c0_14 = arith.constant 0 : index
    %27 = vector.load %arg2[%26, %c0_13, %c0_14] : memref<8x16x128xf32, #tpu.memory_space<vmem>>, vector<1x16x128xf32>
    %28 = vector.shape_cast %27 : vector<1x16x128xf32> to vector<16x128xf32>
    %29 = arith.truncf %25 : vector<16x128xf32> to vector<16x128xbf16>
    %cst_15 = arith.constant dense<0.000000e+00> : vector<16x128xf32>
    %30 = tpu.matmul %29, %3, %cst_15 {dimension_numbers = #tpu.dot_dimension_numbers<[1], [0], [0], [1], [0, 0, 1, 1], [], []>} : vector<16x128xbf16>, vector<128x128xbf16>, vector<16x128xf32> -> vector<16x128xf32>
    %31 = arith.addf %28, %30 : vector<16x128xf32>
    %32 = math.tanh %31 : vector<16x128xf32>
    %c4_i32 = arith.constant 4 : i32
    %33 = arith.index_cast %c4_i32 : i32 to index
    %c0_16 = arith.constant 0 : index
    %c0_17 = arith.constant 0 : index
    %34 = vector.load %arg2[%33, %c0_16, %c0_17] : memref<8x16x128xf32, #tpu.memory_space<vmem>>, vector<1x16x128xf32>
    %35 = vector.shape_cast %34 : vector<1x16x128xf32> to vector<16x128xf32>
    %36 = arith.truncf %32 : vector<16x128xf32> to vector<16x128xbf16>
    %cst_18 = arith.constant dense<0.000000e+00> : vector<16x128xf32>
    %37 = tpu.matmul %36, %3, %cst_18 {dimension_numbers = #tpu.dot_dimension_numbers<[1], [0], [0], [1], [0, 0, 1, 1], [], []>} : vector<16x128xbf16>, vector<128x128xbf16>, vector<16x128xf32> -> vector<16x128xf32>
    %38 = arith.addf %35, %37 : vector<16x128xf32>
    %39 = math.tanh %38 : vector<16x128xf32>
    %c5_i32 = arith.constant 5 : i32
    %40 = arith.index_cast %c5_i32 : i32 to index
    %c0_19 = arith.constant 0 : index
    %c0_20 = arith.constant 0 : index
    %41 = vector.load %arg2[%40, %c0_19, %c0_20] : memref<8x16x128xf32, #tpu.memory_space<vmem>>, vector<1x16x128xf32>
    %42 = vector.shape_cast %41 : vector<1x16x128xf32> to vector<16x128xf32>
    %43 = arith.truncf %39 : vector<16x128xf32> to vector<16x128xbf16>
    %cst_21 = arith.constant dense<0.000000e+00> : vector<16x128xf32>
    %44 = tpu.matmul %43, %3, %cst_21 {dimension_numbers = #tpu.dot_dimension_numbers<[1], [0], [0], [1], [0, 0, 1, 1], [], []>} : vector<16x128xbf16>, vector<128x128xbf16>, vector<16x128xf32> -> vector<16x128xf32>
    %45 = arith.addf %42, %44 : vector<16x128xf32>
    %46 = math.tanh %45 : vector<16x128xf32>
    %c6_i32 = arith.constant 6 : i32
    %47 = arith.index_cast %c6_i32 : i32 to index
    %c0_22 = arith.constant 0 : index
    %c0_23 = arith.constant 0 : index
    %48 = vector.load %arg2[%47, %c0_22, %c0_23] : memref<8x16x128xf32, #tpu.memory_space<vmem>>, vector<1x16x128xf32>
    %49 = vector.shape_cast %48 : vector<1x16x128xf32> to vector<16x128xf32>
    %50 = arith.truncf %46 : vector<16x128xf32> to vector<16x128xbf16>
    %cst_24 = arith.constant dense<0.000000e+00> : vector<16x128xf32>
    %51 = tpu.matmul %50, %3, %cst_24 {dimension_numbers = #tpu.dot_dimension_numbers<[1], [0], [0], [1], [0, 0, 1, 1], [], []>} : vector<16x128xbf16>, vector<128x128xbf16>, vector<16x128xf32> -> vector<16x128xf32>
    %52 = arith.addf %49, %51 : vector<16x128xf32>
    %53 = math.tanh %52 : vector<16x128xf32>
    %c7_i32 = arith.constant 7 : i32
    %54 = arith.index_cast %c7_i32 : i32 to index
    %c0_25 = arith.constant 0 : index
    %c0_26 = arith.constant 0 : index
    %55 = vector.load %arg2[%54, %c0_25, %c0_26] : memref<8x16x128xf32, #tpu.memory_space<vmem>>, vector<1x16x128xf32>
    %56 = vector.shape_cast %55 : vector<1x16x128xf32> to vector<16x128xf32>
    %57 = arith.truncf %53 : vector<16x128xf32> to vector<16x128xbf16>
    %cst_27 = arith.constant dense<0.000000e+00> : vector<16x128xf32>
    %58 = tpu.matmul %57, %3, %cst_27 {dimension_numbers = #tpu.dot_dimension_numbers<[1], [0], [0], [1], [0, 0, 1, 1], [], []>} : vector<16x128xbf16>, vector<128x128xbf16>, vector<16x128xf32> -> vector<16x128xf32>
    %59 = arith.addf %56, %58 : vector<16x128xf32>
    %60 = math.tanh %59 : vector<16x128xf32>
    %c8_i32 = arith.constant 8 : i32
    %c0_28 = arith.constant 0 : index
    %c0_29 = arith.constant 0 : index
    %61 = vector.load %arg7[%c0_28, %c0_29] : memref<16x128xf32, #tpu.memory_space<vmem>>, vector<16x128xf32>
    tpu.vector_store %arg7[%c0_28, %c0_29], %60 {strides = array<i32>} : memref<16x128xf32, #tpu.memory_space<vmem>>, vector<16x128xf32>,
    %c0_i32_30 = arith.constant 0 : i32
    %62 = arith.cmpi eq, %arg1, %c0_i32_30 : i32
    %63 = arith.extui %62 : i1 to i32
    %c0_i32_31 = arith.constant 0 : i32
    %64 = arith.cmpi ne, %63, %c0_i32_31 : i32
    scf.if %64 {
      %65 = arith.truncf %60 : vector<16x128xf32> to vector<16x128xbf16>
      %c0_32 = arith.constant 0 : index
      %c0_33 = arith.constant 0 : index
      %66 = vector.load %arg4[%c0_32, %c0_33] : memref<128x128xbf16, #tpu.memory_space<vmem>>, vector<128x128xbf16>
      %cst_34 = arith.constant dense<0.000000e+00> : vector<16x128xf32>
      %67 = tpu.matmul %65, %66, %cst_34 {dimension_numbers = #tpu.dot_dimension_numbers<[1], [0], [0], [1], [0, 0, 1, 1], [], []>} : vector<16x128xbf16>, vector<128x128xbf16>, vector<16x128xf32> -> vector<16x128xf32>
      %c0_35 = arith.constant 0 : index
      %c0_36 = arith.constant 0 : index
      %68 = vector.load %arg5[%c0_35, %c0_36] : memref<1x128xf32, #tpu.memory_space<vmem>>, vector<1x128xf32>
      %69 = vector.broadcast %68 : vector<1x128xf32> to vector<16x128xf32>
      %70 = arith.addf %67, %69 : vector<16x128xf32>
      %c0_37 = arith.constant 0 : index
      %c0_38 = arith.constant 0 : index
      %71 = vector.load %arg6[%c0_37, %c0_38] : memref<16x128xf32, #tpu.memory_space<vmem>>, vector<16x128xf32>
      tpu.vector_store %arg6[%c0_37, %c0_38], %70 {strides = array<i32>} : memref<16x128xf32, #tpu.memory_space<vmem>>, vector<16x128xf32>,
    } else {
    }
    return
  }
  func.func @transform_0(%arg0: i32, %arg1: i32) -> (i32, i32, i32) {
    %c0_i32 = arith.constant 0 : i32
    %c0_i32_0 = arith.constant 0 : i32
    return %arg1, %arg0, %c0_i32 : i32, i32, i32
  }
  func.func @transform_1(%arg0: i32, %arg1: i32) -> (i32, i32) {
    %c0_i32 = arith.constant 0 : i32
    %c0_i32_0 = arith.constant 0 : i32
    %c0_i32_1 = arith.constant 0 : i32
    return %c0_i32, %c0_i32_0 : i32, i32
  }
  func.func @transform_2(%arg0: i32, %arg1: i32) -> (i32, i32) {
    %c0_i32 = arith.constant 0 : i32
    %c0_i32_0 = arith.constant 0 : i32
    %c0_i32_1 = arith.constant 0 : i32
    return %c0_i32, %c0_i32_0 : i32, i32
  }
  func.func @transform_3(%arg0: i32, %arg1: i32) -> (i32, i32) {
    %c0_i32 = arith.constant 0 : i32
    %c0_i32_0 = arith.constant 0 : i32
    %c0_i32_1 = arith.constant 0 : i32
    return %c0_i32, %c0_i32_0 : i32, i32
  }
  func.func @transform_4(%arg0: i32, %arg1: i32) -> (i32, i32) {
    %c0_i32 = arith.constant 0 : i32
    %c0_i32_0 = arith.constant 0 : i32
    return %arg0, %c0_i32 : i32, i32
  }
}

</mosaic_0001>

<bundles_post_ra>
// kernel: rnn_text_forward.3
= control target key start
LH: loop header
LB: loop body
LE: loop exit
PB: predicated region body
PF: predicated region fallthrough
CT: control target
= control target key end

     0   :  { %v948_v0 = vmov 0.0   ;;  %vm949_vm0 = vmmov 0   ;;  %v950_v9 = vmov 0.0|0.0   ;;  %s1251_s1 = inlined_call_operand.vmem [shape: bf16[128,128], index: 1, kind: input, shape index: {}]   ;;  %s1252_s0 = inlined_call_operand.vmem [shape: f32[8,16,128], index: 0, kind: input, shape index: {}]   ;;  %s1253_s2 = inlined_call_operand.vmem [shape: bf16[128,128], index: 2, kind: input, shape index: {}]   ;;  %s1254_s3 = inlined_call_operand.vmem [shape: f32[1,128], index: 3, kind: input, shape index: {}]   ;;  %s1255_s4 = inlined_call_operand.vmem [shape: f32[16,128], index: 4, kind: output, shape index: {}]  }
   0x1   :  { %717 = vmatprep.subr.bf16.mxu0 %v948_v0  ;;  %v980_v1 = vld [vmem:[%s1251_s1 + $0x38] sm:$0xff]   ;;  %733 = vmatprep.mubr.msk.bf16.mxu0 %vm949_vm0, %v948_v0  ;;  %v991_v2 = vld [vmem:[%s1251_s1 + $0x30] sm:$0xff]   ;;  %v1000_v3 = vld [vmem:[%s1251_s1 + $0x28] sm:$0xff]  }
   0x2   :  { %737 = vmatprep.subr.bf16.mxu1 %v948_v0  ;;  %753 = vmatprep.mubr.msk.bf16.mxu1 %vm949_vm0, %v948_v0  ;;  %v1009_v4 = vld [vmem:[%s1251_s1 + $0x20] sm:$0xff]   ;;  %v1018_v5 = vld [vmem:[%s1251_s1 + $0x18] sm:$0xff]   ;;  %v1027_v6 = vld [vmem:[%s1251_s1 + $0x10] sm:$0xff]  }
   0x3   :  { %718 = vmatpush3.bf16.msra.mxu0 %v980_v1  ;;  %738 = vmatpush3.bf16.msra.mxu1 %v980_v1  ;;  %v1036_v7 = vld [vmem:[%s1251_s1 + $0x8] sm:$0xff]   ;;  %v1045_v8 = vld [vmem:[%s1251_s1] sm:$0xff]   ;;  %v613_v21 = vld [vmem:[%s1252_s0 + $0x10] sm:$0xff] }
   0x4   :  { %719 = vmatprep.subr.bf16.mxu0 %v948_v0  ;;  %739 = vmatprep.subr.bf16.mxu1 %v948_v0  ;;  %v42_v10 = vld [vmem:[%s1252_s0] sm:$0xff]  ;;  %v43_v14 = vld [vmem:[%s1252_s0 + $0x8] sm:$0xff]  ;;  %v614_v25 = vld [vmem:[%s1252_s0 + $0x18] sm:$0xff] }
   0x5   :  { %v615_v32 = vld [vmem:[%s1252_s0 + $0x20] sm:$0xff]  ;;  %v616_v36 = vld [vmem:[%s1252_s0 + $0x28] sm:$0xff]  ;;  %v617_v43 = vld [vmem:[%s1252_s0 + $0x30] sm:$0xff] }
   0x6   :  { %v618_v47 = vld [vmem:[%s1252_s0 + $0x38] sm:$0xff]  ;;  %v619_v54 = vld [vmem:[%s1252_s0 + $0x40] sm:$0xff]  ;;  %v620_v58 = vld [vmem:[%s1252_s0 + $0x48] sm:$0xff] }
   0x7   :  { %720 = vmatpush3.bf16.msra.mxu0 %v991_v2  ;;  %740 = vmatpush3.bf16.msra.mxu1 %v991_v2 }
   0x8   :  { %721 = vmatprep.subr.bf16.mxu0 %v948_v0  ;;  %741 = vmatprep.subr.bf16.mxu1 %v948_v0 }
   0xb   :  { %722 = vmatpush3.bf16.msra.mxu0 %v1000_v3  ;;  %742 = vmatpush3.bf16.msra.mxu1 %v1000_v3 }
   0xc   :  { %723 = vmatprep.subr.bf16.mxu0 %v948_v0  ;;  %743 = vmatprep.subr.bf16.mxu1 %v948_v0 }
   0xf   :  { %724 = vmatpush3.bf16.msra.mxu0 %v1009_v4  ;;  %744 = vmatpush3.bf16.msra.mxu1 %v1009_v4 }
  0x10   :  { %725 = vmatprep.subr.bf16.mxu0 %v948_v0  ;;  %745 = vmatprep.subr.bf16.mxu1 %v948_v0 }
  0x13   :  { %726 = vmatpush3.bf16.msra.mxu0 %v1018_v5  ;;  %746 = vmatpush3.bf16.msra.mxu1 %v1018_v5 }
  0x14   :  { %727 = vmatprep.subr.bf16.mxu0 %v948_v0  ;;  %747 = vmatprep.subr.bf16.mxu1 %v948_v0 }
  0x17   :  { %728 = vmatpush3.bf16.msra.mxu0 %v1027_v6  ;;  %748 = vmatpush3.bf16.msra.mxu1 %v1027_v6 }
  0x18   :  { %729 = vmatprep.subr.bf16.mxu0 %v948_v0  ;;  %749 = vmatprep.subr.bf16.mxu1 %v948_v0 }
  0x1b   :  { %730 = vmatpush3.bf16.msra.mxu0 %v1036_v7  ;;  %750 = vmatpush3.bf16.msra.mxu1 %v1036_v7 }
  0x1c   :  { %731 = vmatprep.subr.bf16.mxu0 %v948_v0  ;;  %751 = vmatprep.subr.bf16.mxu1 %v948_v0 }
  0x1f   :  { %732 = vmatpush3.bf16.msra.mxu0 %v1045_v8  ;;  %752 = vmatpush3.bf16.msra.mxu1 %v1045_v8 }
  0x20   :  { %757 = vmatprep.subr.bf16.mxu0 %v948_v0  ;;  %777 = vmatprep.subr.bf16.mxu1 %v948_v0 }
  0x22   :  { %734 = vmatmul.mubr.bf16.vlgmr.msra.gmra.mxu0 %v950_v9 }
  0x23   :  { %758 = vmatpush3.bf16.msra.mxu0 %v980_v1  ;;  %773 = vmatprep.mubr.msk.bf16.mxu0 %vm949_vm0, %v948_v0 }
  0x24   :  { %759 = vmatprep.subr.bf16.mxu0 %v948_v0 }
  0x27   :  { %760 = vmatpush3.bf16.msra.mxu0 %v991_v2 }
  0x28   :  { %761 = vmatprep.subr.bf16.mxu0 %v948_v0 }
  0x2b   :  { %762 = vmatpush3.bf16.msra.mxu0 %v1000_v3 }
  0x2c   :  { %763 = vmatprep.subr.bf16.mxu0 %v948_v0 }
  0x2f   :  { %764 = vmatpush3.bf16.msra.mxu0 %v1009_v4 }
  0x30   :  { %765 = vmatprep.subr.bf16.mxu0 %v948_v0 }
  0x33   :  { %766 = vmatpush3.bf16.msra.mxu0 %v1018_v5 }
  0x34   :  { %767 = vmatprep.subr.bf16.mxu0 %v948_v0 }
  0x37   :  { %768 = vmatpush3.bf16.msra.mxu0 %v1027_v6 }
  0x38   :  { %769 = vmatprep.subr.bf16.mxu0 %v948_v0 }
  0x3b   :  { %770 = vmatpush3.bf16.msra.mxu0 %v1036_v7 }
  0x3c   :  { %771 = vmatprep.subr.bf16.mxu0 %v948_v0 }
  0x3f   :  { %772 = vmatpush3.bf16.msra.mxu0 %v1045_v8 }
  0x40   :  { %797 = vmatprep.subr.bf16.mxu0 %v948_v0 }
  0xe2   :  { %v127_v11 = vpop.f32.mrf.mxu0 }
  0xe3   :  { %v134_v12 = vadd.f32 %v127_v11, %v42_v10 }
  0xe4   :  { %v735_v13 = vpop.f32.mrf.mxu0 }
  0xe5   :  { %916 = vtanh.f32 %v134_v12 }
  0xe6   :  { %v130_v15 = vpop.f32.mrf.mxu0 }
  0xe7   :  { %v135_v16 = vadd.f32 %v130_v15, %v43_v14  ;;  %v909_v14 = vld [vmem:[%s1253_s2 + $0x30] sm:$0xff]   ;;  %v623_v15 = vld [vmem:[%s1252_s0 + $0x60] sm:$0xff] }
  0xe8   :  { %v736_v17 = vpop.f32.mrf.mxu0 }
  0xe9   :  { %918 = vtanh.f32 %v135_v16 }
  0xf2   :  { %v917_v18 = vpop.eup %916 }
  0xf6   :  { %v919_v19 = vpop.eup %918 }
  0xf7   :  { %v141_v20 = vpack.c.bf16 %v919_v19, %v917_v18  ;;  %v624_v19 = vld [vmem:[%s1252_s0 + $0x68] sm:$0xff] }
  0xf9   :  { %754 = vmatmul.mubr.bf16.vlgmr.msra.gmra.mxu1 %v141_v20 }
  0xfa   :  { %778 = vmatpush3.bf16.msra.mxu1 %v980_v1  ;;  %793 = vmatprep.mubr.msk.bf16.mxu1 %vm949_vm0, %v948_v0 }
  0xfb   :  { %779 = vmatprep.subr.bf16.mxu1 %v948_v0 }
  0xfe   :  { %780 = vmatpush3.bf16.msra.mxu1 %v991_v2 }
  0xff   :  { %781 = vmatprep.subr.bf16.mxu1 %v948_v0 }
 0x102   :  { %782 = vmatpush3.bf16.msra.mxu1 %v1000_v3 }
 0x103   :  { %783 = vmatprep.subr.bf16.mxu1 %v948_v0 }
 0x106   :  { %784 = vmatpush3.bf16.msra.mxu1 %v1009_v4 }
 0x107   :  { %785 = vmatprep.subr.bf16.mxu1 %v948_v0 }
 0x10a   :  { %786 = vmatpush3.bf16.msra.mxu1 %v1018_v5 }
 0x10b   :  { %787 = vmatprep.subr.bf16.mxu1 %v948_v0 }
 0x10e   :  { %788 = vmatpush3.bf16.msra.mxu1 %v1027_v6 }
 0x10f   :  { %789 = vmatprep.subr.bf16.mxu1 %v948_v0 }
 0x112   :  { %790 = vmatpush3.bf16.msra.mxu1 %v1036_v7 }
 0x113   :  { %791 = vmatprep.subr.bf16.mxu1 %v948_v0 }
 0x116   :  { %792 = vmatpush3.bf16.msra.mxu1 %v1045_v8 }
 0x117   :  { %817 = vmatprep.subr.bf16.mxu1 %v948_v0 }
 0x1b9   :  { %v176_v22 = vpop.f32.mrf.mxu1 }
 0x1ba   :  { %v183_v23 = vadd.f32 %v613_v21, %v176_v22 }
 0x1bb   :  { %v755_v24 = vpop.f32.mrf.mxu1 }
 0x1bc   :  { %920 = vtanh.f32 %v183_v23 }
 0x1bd   :  { %v179_v26 = vpop.f32.mrf.mxu1 }
 0x1be   :  { %v184_v27 = vadd.f32 %v614_v25, %v179_v26  ;;  %v910_v26 = vld [vmem:[%s1253_s2 + $0x28] sm:$0xff]  }
 0x1bf   :  { %v756_v28 = vpop.f32.mrf.mxu1 }
 0x1c0   :  { %922 = vtanh.f32 %v184_v27  ;;  %v911_v27 = vld [vmem:[%s1253_s2 + $0x20] sm:$0xff]   ;;  %v912_v28 = vld [vmem:[%s1253_s2 + $0x18] sm:$0xff]  }
 0x1c9   :  { %v921_v29 = vpop.eup %920 }
 0x1cd   :  { %v923_v30 = vpop.eup %922 }
 0x1ce   :  { %v190_v31 = vpack.c.bf16 %v923_v30, %v921_v29  ;;  %v913_v29 = vld [vmem:[%s1253_s2 + $0x10] sm:$0xff]   ;;  %v914_v30 = vld [vmem:[%s1253_s2 + $0x8] sm:$0xff]  }
 0x1d0   :  { %774 = vmatmul.mubr.bf16.vlgmr.msra.gmra.mxu0 %v190_v31  ;;  %v915_v31 = vld [vmem:[%s1253_s2] sm:$0xff]  }
 0x1d1   :  { %798 = vmatpush3.bf16.msra.mxu0 %v980_v1  ;;  %813 = vmatprep.mubr.msk.bf16.mxu0 %vm949_vm0, %v948_v0 }
 0x1d2   :  { %799 = vmatprep.subr.bf16.mxu0 %v948_v0 }
 0x1d5   :  { %800 = vmatpush3.bf16.msra.mxu0 %v991_v2 }
 0x1d6   :  { %801 = vmatprep.subr.bf16.mxu0 %v948_v0 }
 0x1d9   :  { %802 = vmatpush3.bf16.msra.mxu0 %v1000_v3 }
 0x1da   :  { %803 = vmatprep.subr.bf16.mxu0 %v948_v0 }
 0x1dd   :  { %804 = vmatpush3.bf16.msra.mxu0 %v1009_v4 }
 0x1de   :  { %805 = vmatprep.subr.bf16.mxu0 %v948_v0 }
 0x1e1   :  { %806 = vmatpush3.bf16.msra.mxu0 %v1018_v5 }
 0x1e2   :  { %807 = vmatprep.subr.bf16.mxu0 %v948_v0 }
 0x1e5   :  { %808 = vmatpush3.bf16.msra.mxu0 %v1027_v6 }
 0x1e6   :  { %809 = vmatprep.subr.bf16.mxu0 %v948_v0 }
 0x1e9   :  { %810 = vmatpush3.bf16.msra.mxu0 %v1036_v7 }
 0x1ea   :  { %811 = vmatprep.subr.bf16.mxu0 %v948_v0 }
 0x1ed   :  { %812 = vmatpush3.bf16.msra.mxu0 %v1045_v8 }
 0x1ee   :  { %837 = vmatprep.subr.bf16.mxu0 %v948_v0 }
 0x290   :  { %v225_v33 = vpop.f32.mrf.mxu0 }
 0x291   :  { %v232_v34 = vadd.f32 %v615_v32, %v225_v33  ;;  %v625_v32 = vld [vmem:[%s1252_s0 + $0x70] sm:$0xff] }
 0x292   :  { %v775_v35 = vpop.f32.mrf.mxu0 }
 0x293   :  { %924 = vtanh.f32 %v232_v34 }
 0x294   :  { %v228_v37 = vpop.f32.mrf.mxu0 }
 0x295   :  { %v233_v38 = vadd.f32 %v616_v36, %v228_v37  ;;  %v626_v36 = vld [vmem:[%s1252_s0 + $0x78] sm:$0xff] }
 0x296   :  { %v776_v39 = vpop.f32.mrf.mxu0 }
 0x297   :  { %926 = vtanh.f32 %v233_v38 }
 0x2a0   :  { %v925_v40 = vpop.eup %924 }
 0x2a4   :  { %v927_v41 = vpop.eup %926 }
 0x2a5   :  { %v239_v42 = vpack.c.bf16 %v927_v41, %v925_v40 }
 0x2a7   :  { %794 = vmatmul.mubr.bf16.vlgmr.msra.gmra.mxu1 %v239_v42  ;;  %v627_v42 = vld [vmem:[%s1254_s3] ss:$0 sm:$0xff] }
 0x2a8   :  { %818 = vmatpush3.bf16.msra.mxu1 %v980_v1  ;;  %833 = vmatprep.mubr.msk.bf16.mxu1 %vm949_vm0, %v948_v0 }
 0x2a9   :  { %819 = vmatprep.subr.bf16.mxu1 %v948_v0 }
 0x2ac   :  { %820 = vmatpush3.bf16.msra.mxu1 %v991_v2 }
 0x2ad   :  { %821 = vmatprep.subr.bf16.mxu1 %v948_v0 }
 0x2b0   :  { %822 = vmatpush3.bf16.msra.mxu1 %v1000_v3 }
 0x2b1   :  { %823 = vmatprep.subr.bf16.mxu1 %v948_v0 }
 0x2b4   :  { %824 = vmatpush3.bf16.msra.mxu1 %v1009_v4 }
 0x2b5   :  { %825 = vmatprep.subr.bf16.mxu1 %v948_v0 }
 0x2b8   :  { %826 = vmatpush3.bf16.msra.mxu1 %v1018_v5 }
 0x2b9   :  { %827 = vmatprep.subr.bf16.mxu1 %v948_v0 }
 0x2bc   :  { %828 = vmatpush3.bf16.msra.mxu1 %v1027_v6 }
 0x2bd   :  { %829 = vmatprep.subr.bf16.mxu1 %v948_v0 }
 0x2c0   :  { %830 = vmatpush3.bf16.msra.mxu1 %v1036_v7 }
 0x2c1   :  { %831 = vmatprep.subr.bf16.mxu1 %v948_v0 }
 0x2c4   :  { %832 = vmatpush3.bf16.msra.mxu1 %v1045_v8 }
 0x2c5   :  { %857 = vmatprep.subr.bf16.mxu1 %v948_v0 }
 0x367   :  { %v274_v44 = vpop.f32.mrf.mxu1 }
 0x368   :  { %v281_v45 = vadd.f32 %v617_v43, %v274_v44 }
 0x369   :  { %v795_v46 = vpop.f32.mrf.mxu1 }
 0x36a   :  { %928 = vtanh.f32 %v281_v45 }
 0x36b   :  { %v277_v48 = vpop.f32.mrf.mxu1 }
 0x36c   :  { %v282_v49 = vadd.f32 %v618_v47, %v277_v48 }
 0x36d   :  { %v796_v50 = vpop.f32.mrf.mxu1 }
 0x36e   :  { %930 = vtanh.f32 %v282_v49 }
 0x377   :  { %v929_v51 = vpop.eup %928 }
 0x37b   :  { %v931_v52 = vpop.eup %930 }
 0x37c   :  { %v288_v53 = vpack.c.bf16 %v931_v52, %v929_v51 }
 0x37e   :  { %814 = vmatmul.mubr.bf16.vlgmr.msra.gmra.mxu0 %v288_v53 }
 0x37f   :  { %838 = vmatpush3.bf16.msra.mxu0 %v980_v1  ;;  %853 = vmatprep.mubr.msk.bf16.mxu0 %vm949_vm0, %v948_v0 }
 0x380   :  { %839 = vmatprep.subr.bf16.mxu0 %v948_v0 }
 0x383   :  { %840 = vmatpush3.bf16.msra.mxu0 %v991_v2 }
 0x384   :  { %841 = vmatprep.subr.bf16.mxu0 %v948_v0 }
 0x387   :  { %842 = vmatpush3.bf16.msra.mxu0 %v1000_v3 }
 0x388   :  { %843 = vmatprep.subr.bf16.mxu0 %v948_v0 }
 0x38b   :  { %844 = vmatpush3.bf16.msra.mxu0 %v1009_v4 }
 0x38c   :  { %845 = vmatprep.subr.bf16.mxu0 %v948_v0 }
 0x38f   :  { %846 = vmatpush3.bf16.msra.mxu0 %v1018_v5 }
 0x390   :  { %847 = vmatprep.subr.bf16.mxu0 %v948_v0 }
 0x393   :  { %848 = vmatpush3.bf16.msra.mxu0 %v1027_v6 }
 0x394   :  { %849 = vmatprep.subr.bf16.mxu0 %v948_v0 }
 0x397   :  { %850 = vmatpush3.bf16.msra.mxu0 %v1036_v7 }
 0x398   :  { %851 = vmatprep.subr.bf16.mxu0 %v948_v0 }
 0x39b   :  { %852 = vmatpush3.bf16.msra.mxu0 %v1045_v8 }
 0x39c   :  { %877 = vmatprep.subr.bf16.mxu0 %v948_v0 }
 0x43e   :  { %v323_v55 = vpop.f32.mrf.mxu0 }
 0x43f   :  { %v330_v56 = vadd.f32 %v619_v54, %v323_v55 }
 0x440   :  { %v815_v57 = vpop.f32.mrf.mxu0 }
 0x441   :  { %932 = vtanh.f32 %v330_v56 }
 0x442   :  { %v326_v59 = vpop.f32.mrf.mxu0 }
 0x443   :  { %v331_v60 = vadd.f32 %v620_v58, %v326_v59 }
 0x444   :  { %v816_v61 = vpop.f32.mrf.mxu0 }
 0x445   :  { %934 = vtanh.f32 %v331_v60 }
 0x44e   :  { %v933_v62 = vpop.eup %932 }
 0x452   :  { %v935_v63 = vpop.eup %934 }
 0x453   :  { %v337_v9 = vpack.c.bf16 %v935_v63, %v933_v62 }
 0x455   :  { %834 = vmatmul.mubr.bf16.vlgmr.msra.gmra.mxu1 %v337_v9 }
 0x456   :  { %858 = vmatpush3.bf16.msra.mxu1 %v980_v1  ;;  %873 = vmatprep.mubr.msk.bf16.mxu1 %vm949_vm0, %v948_v0  ;;  %v621_v1 = vld [vmem:[%s1252_s0 + $0x50] sm:$0xff] }
 0x457   :  { %859 = vmatprep.subr.bf16.mxu1 %v948_v0 }
 0x45a   :  { %860 = vmatpush3.bf16.msra.mxu1 %v991_v2 }
 0x45b   :  { %861 = vmatprep.subr.bf16.mxu1 %v948_v0 }
 0x45e   :  { %862 = vmatpush3.bf16.msra.mxu1 %v1000_v3 }
 0x45f   :  { %863 = vmatprep.subr.bf16.mxu1 %v948_v0 }
 0x462   :  { %864 = vmatpush3.bf16.msra.mxu1 %v1009_v4 }
 0x463   :  { %865 = vmatprep.subr.bf16.mxu1 %v948_v0 }
 0x466   :  { %866 = vmatpush3.bf16.msra.mxu1 %v1018_v5  ;;  %v622_v5 = vld [vmem:[%s1252_s0 + $0x58] sm:$0xff] }
 0x467   :  { %867 = vmatprep.subr.bf16.mxu1 %v948_v0 }
 0x46a   :  { %868 = vmatpush3.bf16.msra.mxu1 %v1027_v6 }
 0x46b   :  { %869 = vmatprep.subr.bf16.mxu1 %v948_v0 }
 0x46e   :  { %870 = vmatpush3.bf16.msra.mxu1 %v1036_v7 }
 0x46f   :  { %871 = vmatprep.subr.bf16.mxu1 %v948_v0 }
 0x472   :  { %872 = vmatpush3.bf16.msra.mxu1 %v1045_v8  ;;  %v908_v8 = vld [vmem:[%s1253_s2 + $0x38] sm:$0xff]  }
 0x515   :  { %v372_v2 = vpop.f32.mrf.mxu1 }
 0x516   :  { %v379_v3 = vadd.f32 %v621_v1, %v372_v2 }
 0x517   :  { %v835_v4 = vpop.f32.mrf.mxu1 }
 0x518   :  { %936 = vtanh.f32 %v379_v3 }
 0x519   :  { %v375_v6 = vpop.f32.mrf.mxu1 }
 0x51a   :  { %v380_v10 = vadd.f32 %v622_v5, %v375_v6 }
 0x51b   :  { %v836_v11 = vpop.f32.mrf.mxu1 }
 0x51c   :  { %938 = vtanh.f32 %v380_v10 }
 0x525   :  { %v937_v7 = vpop.eup %936 }
 0x529   :  { %v939_v12 = vpop.eup %938 }
 0x52a   :  { %v386_v13 = vpack.c.bf16 %v939_v12, %v937_v7 }
 0x52c   :  { %854 = vmatmul.mubr.bf16.vlgmr.msra.gmra.mxu0 %v386_v13 }
 0x52d   :  { %893 = vmatprep.mubr.msk.bf16.mxu0 %vm949_vm0, %v948_v0  ;;  %878 = vmatpush3.bf16.msra.mxu0 %v908_v8 }
 0x52e   :  { %879 = vmatprep.subr.bf16.mxu0 %v948_v0 }
 0x531   :  { %880 = vmatpush3.bf16.msra.mxu0 %v909_v14 }
 0x532   :  { %881 = vmatprep.subr.bf16.mxu0 %v948_v0 }
 0x535   :  { %882 = vmatpush3.bf16.msra.mxu0 %v910_v26 }
 0x536   :  { %883 = vmatprep.subr.bf16.mxu0 %v948_v0 }
 0x539   :  { %884 = vmatpush3.bf16.msra.mxu0 %v911_v27 }
 0x53a   :  { %885 = vmatprep.subr.bf16.mxu0 %v948_v0 }
 0x53d   :  { %886 = vmatpush3.bf16.msra.mxu0 %v912_v28 }
 0x53e   :  { %887 = vmatprep.subr.bf16.mxu0 %v948_v0 }
 0x541   :  { %888 = vmatpush3.bf16.msra.mxu0 %v913_v29 }
 0x542   :  { %889 = vmatprep.subr.bf16.mxu0 %v948_v0 }
 0x545   :  { %890 = vmatpush3.bf16.msra.mxu0 %v914_v30 }
 0x546   :  { %891 = vmatprep.subr.bf16.mxu0 %v948_v0 }
 0x549   :  { %892 = vmatpush3.bf16.msra.mxu0 %v915_v31 }
 0x5ec   :  { %v421_v16 = vpop.f32.mrf.mxu0 }
 0x5ed   :  { %v428_v17 = vadd.f32 %v623_v15, %v421_v16 }
 0x5ee   :  { %v855_v18 = vpop.f32.mrf.mxu0 }
 0x5ef   :  { %940 = vtanh.f32 %v428_v17 }
 0x5f0   :  { %v424_v20 = vpop.f32.mrf.mxu0 }
 0x5f1   :  { %v429_v21 = vadd.f32 %v624_v19, %v424_v20 }
 0x5f2   :  { %v856_v22 = vpop.f32.mrf.mxu0 }
 0x5f3   :  { %942 = vtanh.f32 %v429_v21 }
 0x5fc   :  { %v941_v23 = vpop.eup %940 }
 0x600   :  { %v943_v24 = vpop.eup %942 }
 0x601   :  { %v435_v25 = vpack.c.bf16 %v943_v24, %v941_v23 }
 0x603   :  { %874 = vmatmul.mubr.bf16.vlgmr.msra.gmra.mxu1 %v435_v25 }
 0x6c3   :  { %v470_v33 = vpop.f32.mrf.mxu1 }
 0x6c4   :  { %v477_v34 = vadd.f32 %v625_v32, %v470_v33 }
 0x6c5   :  { %v875_v35 = vpop.f32.mrf.mxu1 }
 0x6c6   :  { %944 = vtanh.f32 %v477_v34 }
 0x6c7   :  { %v473_v37 = vpop.f32.mrf.mxu1 }
 0x6c8   :  { %v478_v38 = vadd.f32 %v626_v36, %v473_v37 }
 0x6c9   :  { %v876_v39 = vpop.f32.mrf.mxu1 }
 0x6ca   :  { %946 = vtanh.f32 %v478_v38 }
 0x6d3   :  { %v945_v40 = vpop.eup %944 }
 0x6d7   :  { %v947_v41 = vpop.eup %946 }
 0x6d8   :  { %v486_v0 = vpack.c.bf16 %v947_v41, %v945_v40 }
 0x6da   :  { %894 = vmatmul.mubr.bf16.vlgmr.msra.gmra.mxu0 %v486_v0 }
 0x79a   :  { %v592_v43 = vpop.f32.mrf.mxu0 }
 0x79b   :  { %v593_v44 = vadd.f32 %v627_v42, %v592_v43 }
 0x79c   :  { %v895_v45 = vpop.f32.mrf.mxu0 }
 0x79d   :  { %599 = vst [vmem:[%s1255_s4] sm:$0xff] %v593_v44 }
 0x79e   :  { %v595_v46 = vpop.f32.mrf.mxu0 }
 0x79f   :  { %v596_v47 = vadd.f32 %v627_v42, %v595_v46 }
 0x7a0   :  { %v896_v48 = vpop.f32.mrf.mxu0 }
 0x7a1   :  { %600 = vst [vmem:[%s1255_s4 + $0x8] sm:$0xff] %v596_v47 }

// kernel: rnn_text_forward.2
= control target key start
LH: loop header
LB: loop body
LE: loop exit
PB: predicated region body
PF: predicated region fallthrough
CT: control target
= control target key end

     0   :  { %s483_s1 = inlined_call_operand.vmem [shape: bf16[128,128], index: 1, kind: input, shape index: {}]   ;;  %s484_s0 = inlined_call_operand.vmem [shape: bf16[8,16,128], index: 0, kind: input, shape index: {}]   ;;  %s485_s2 = inlined_call_operand.vmem [shape: f32[1,128], index: 2, kind: input, shape index: {}]   ;;  %s486_s3 = inlined_call_operand.vmem [shape: f32[8,16,128], index: 3, kind: output, shape index: {}]  }
   0x1   :  { %v348_v0 = vld [vmem:[%s483_s1 + $0x38] sm:$0xff]   ;;  %v349_v1 = vld [vmem:[%s483_s1 + $0x30] sm:$0xff]   ;;  %v350_v2 = vld [vmem:[%s483_s1 + $0x28] sm:$0xff]  }
   0x2   :  { %300 = vmatprep.subr.bf16.mxu0 %v348_v0  ;;  %332 = vmatprep.subr.bf16.mxu1 %v348_v0  ;;  %v351_v3 = vld [vmem:[%s483_s1 + $0x20] sm:$0xff]   ;;  %v352_v6 = vld [vmem:[%s483_s1 + $0x18] sm:$0xff]   ;;  %v353_v7 = vld [vmem:[%s483_s1 + $0x10] sm:$0xff]  }
   0x3   :  { %301 = vmatpush3.bf16.msra.mxu0 %v348_v0  ;;  %340 = vmatpush3.bf16.msra.mxu1 %v348_v0  ;;  %v356_v4 = vld [vmem:[%s484_s0] sm:$0xff]   ;;  %v354_v8 = vld [vmem:[%s483_s1 + $0x8] sm:$0xff]   ;;  %v360_v12 = vld [vmem:[%s484_s0 + $0x10] sm:$0xff]  }
   0x4   :  { %302 = vmatprep.subr.bf16.mxu0 %v349_v1  ;;  %333 = vmatprep.subr.bf16.mxu1 %v349_v1  ;;  %v357_v5 = vld [vmem:[%s484_s0 + $0x20] sm:$0xff]   ;;  %v358_v10 = vld [vmem:[%s484_s0 + $0x8] sm:$0xff]   ;;  %v361_v13 = vld [vmem:[%s484_s0 + $0x30] sm:$0xff]  }
   0x5   :  { %316 = vmatprep.mubr.bf16.mxu0 %v356_v4  ;;  %324 = vmatprep.mubr.bf16.mxu1 %v357_v5  ;;  %v355_v9 = vld [vmem:[%s483_s1] sm:$0xff]   ;;  %v359_v11 = vld [vmem:[%s484_s0 + $0x28] sm:$0xff]   ;;  %v362_v14 = vld [vmem:[%s484_s0 + $0x18] sm:$0xff]  }
   0x6   :  { %v363_v15 = vld [vmem:[%s484_s0 + $0x38] sm:$0xff]   ;;  %v267_v16 = vld [vmem:[%s485_s2] ss:$0 sm:$0xff] }
   0x7   :  { %303 = vmatpush3.bf16.msra.mxu0 %v349_v1  ;;  %341 = vmatpush3.bf16.msra.mxu1 %v349_v1 }
   0x8   :  { %304 = vmatprep.subr.bf16.mxu0 %v350_v2  ;;  %334 = vmatprep.subr.bf16.mxu1 %v350_v2 }
   0xb   :  { %305 = vmatpush3.bf16.msra.mxu0 %v350_v2  ;;  %342 = vmatpush3.bf16.msra.mxu1 %v350_v2 }
   0xc   :  { %306 = vmatprep.subr.bf16.mxu0 %v351_v3  ;;  %335 = vmatprep.subr.bf16.mxu1 %v351_v3 }
   0xf   :  { %307 = vmatpush3.bf16.msra.mxu0 %v351_v3  ;;  %343 = vmatpush3.bf16.msra.mxu1 %v351_v3 }
  0x10   :  { %308 = vmatprep.subr.bf16.mxu0 %v352_v6  ;;  %336 = vmatprep.subr.bf16.mxu1 %v352_v6 }
  0x13   :  { %309 = vmatpush3.bf16.msra.mxu0 %v352_v6  ;;  %344 = vmatpush3.bf16.msra.mxu1 %v352_v6 }
  0x14   :  { %310 = vmatprep.subr.bf16.mxu0 %v353_v7  ;;  %337 = vmatprep.subr.bf16.mxu1 %v353_v7 }
  0x17   :  { %311 = vmatpush3.bf16.msra.mxu0 %v353_v7  ;;  %345 = vmatpush3.bf16.msra.mxu1 %v353_v7 }
  0x18   :  { %312 = vmatprep.subr.bf16.mxu0 %v354_v8  ;;  %338 = vmatprep.subr.bf16.mxu1 %v354_v8 }
  0x1b   :  { %313 = vmatpush3.bf16.msra.mxu0 %v354_v8  ;;  %346 = vmatpush3.bf16.msra.mxu1 %v354_v8 }
  0x1c   :  { %314 = vmatprep.subr.bf16.mxu0 %v355_v9  ;;  %339 = vmatprep.subr.bf16.mxu1 %v355_v9 }
  0x1f   :  { %315 = vmatpush3.bf16.msra.mxu0 %v355_v9  ;;  %347 = vmatpush3.bf16.msra.mxu1 %v355_v9 }
  0x22   :  { %317 = vmatmul.mubr.bf16.vlgmr.msra.gmra.mxu0 %v358_v10  ;;  %325 = vmatmul.mubr.bf16.vlgmr.msra.gmra.mxu1 %v359_v11 }
  0x23   :  { %320 = vmatprep.mubr.bf16.mxu0 %v360_v12  ;;  %328 = vmatprep.mubr.bf16.mxu1 %v361_v13 }
  0x2a   :  { %321 = vmatmul.mubr.bf16.gmra.mxu0 %v362_v14  ;;  %329 = vmatmul.mubr.bf16.gmra.mxu1 %v363_v15 }
  0xe2   :  { %v318_v17 = vpop.f32.mrf.mxu0  ;;  %v326_v18 = vpop.f32.mrf.mxu1 }
  0xe3   :  { %v193_v19 = vadd.f32 %v318_v17, %v267_v16  ;;  %v225_v20 = vadd.f32 %v326_v18, %v267_v16 }
  0xe4   :  { %v184_v21 = vpop.f32.mrf.mxu0  ;;  %v216_v22 = vpop.f32.mrf.mxu1 }
  0xe5   :  { %249 = vst [vmem:[%s486_s3 + $0x10] sm:$0xff] %v193_v19  ;;  %257 = vst [vmem:[%s486_s3 + $0x50] sm:$0xff] %v225_v20  ;;  %v185_v23 = vadd.f32 %v267_v16, %v184_v21  ;;  %v217_v24 = vadd.f32 %v267_v16, %v216_v22 }
  0xe6   :  { %v319_v25 = vpop.f32.mrf.mxu0  ;;  %v327_v26 = vpop.f32.mrf.mxu1 }
  0xe7   :  { %247 = vst [vmem:[%s486_s3] sm:$0xff] %v185_v23  ;;  %255 = vst [vmem:[%s486_s3 + $0x40] sm:$0xff] %v217_v24  ;;  %v196_v27 = vadd.f32 %v319_v25, %v267_v16  ;;  %v228_v28 = vadd.f32 %v327_v26, %v267_v16 }
  0xe8   :  { %v187_v29 = vpop.f32.mrf.mxu0  ;;  %v219_v30 = vpop.f32.mrf.mxu1 }
  0xe9   :  { %250 = vst [vmem:[%s486_s3 + $0x18] sm:$0xff] %v196_v27  ;;  %258 = vst [vmem:[%s486_s3 + $0x58] sm:$0xff] %v228_v28  ;;  %v188_v31 = vadd.f32 %v267_v16, %v187_v29  ;;  %v220_v32 = vadd.f32 %v267_v16, %v219_v30 }
  0xea   :  { %v322_v33 = vpop.f32.mrf.mxu0  ;;  %v330_v34 = vpop.f32.mrf.mxu1 }
  0xeb   :  { %248 = vst [vmem:[%s486_s3 + $0x8] sm:$0xff] %v188_v31  ;;  %256 = vst [vmem:[%s486_s3 + $0x48] sm:$0xff] %v220_v32  ;;  %v209_v35 = vadd.f32 %v322_v33, %v267_v16  ;;  %v241_v36 = vadd.f32 %v330_v34, %v267_v16 }
  0xec   :  { %v200_v37 = vpop.f32.mrf.mxu0  ;;  %v232_v38 = vpop.f32.mrf.mxu1 }
  0xed   :  { %253 = vst [vmem:[%s486_s3 + $0x30] sm:$0xff] %v209_v35  ;;  %261 = vst [vmem:[%s486_s3 + $0x70] sm:$0xff] %v241_v36  ;;  %v201_v39 = vadd.f32 %v267_v16, %v200_v37  ;;  %v233_v40 = vadd.f32 %v267_v16, %v232_v38 }
  0xee   :  { %v323_v41 = vpop.f32.mrf.mxu0  ;;  %v331_v42 = vpop.f32.mrf.mxu1 }
  0xef   :  { %251 = vst [vmem:[%s486_s3 + $0x20] sm:$0xff] %v201_v39  ;;  %259 = vst [vmem:[%s486_s3 + $0x60] sm:$0xff] %v233_v40  ;;  %v212_v43 = vadd.f32 %v323_v41, %v267_v16  ;;  %v244_v44 = vadd.f32 %v331_v42, %v267_v16 }
  0xf0   :  { %v203_v45 = vpop.f32.mrf.mxu0  ;;  %v235_v46 = vpop.f32.mrf.mxu1 }
  0xf1   :  { %254 = vst [vmem:[%s486_s3 + $0x38] sm:$0xff] %v212_v43  ;;  %262 = vst [vmem:[%s486_s3 + $0x78] sm:$0xff] %v244_v44  ;;  %v204_v47 = vadd.f32 %v267_v16, %v203_v45  ;;  %v236_v48 = vadd.f32 %v267_v16, %v235_v46 }
  0xf3   :  { %252 = vst [vmem:[%s486_s3 + $0x28] sm:$0xff] %v204_v47  ;;  %260 = vst [vmem:[%s486_s3 + $0x68] sm:$0xff] %v236_v48 }

</bundles_post_ra>
